<compile_context>
chip_gen: v7x
topology: tpu7x:2x2x1
jax: 0.10.0
libtpu: 0.0.40
codegen_flags: <defaults>
</compile_context>

<pallas_src>
import functools
import math

import jax
import jax.numpy as jnp
from jax.experimental import pallas as pl
from jax.experimental.pallas import tpu as pltpu


# ----------------------------------------------------------------------------
# Pallas kernel: accumulates all O(N*D) / O(N) partial sums of committor_loss
# ----------------------------------------------------------------------------
def _committor_accum_kernel(grad_ref, wv_ref, scal_ref, acc_ref, svec_ref, *,
                            separate_boundary_dataset, z_threshold):
    """One (core_split, tile) grid point.

    grad_ref : (TILE_N, D)    dq/dx block (native dtype, cast to f32 here)
    wv_ref   : (TILE_N, 1)    masked & delta_f-adjusted variational weights
    scal_ref : (8, TILE_N)    lane-dense rows: [q, z, labels, valid, 0, 0, 0, 0]
    acc_ref  : (1, 1, D)      resident accumulator: sum_i wv_i * grad[i, d]^2
    svec_ref : (1, 8, TILE_N) resident lane-dense accumulators, rows:
               [n_var, n_A, n_B, sum_A q^2, sum_B (q-1)^2, z_over^2, 0, 0]
    """
    f32 = jnp.float32

    @pl.when(pl.program_id(1) == 0)
    def _init():
        acc_ref[...] = jnp.zeros_like(acc_ref)
        svec_ref[...] = jnp.zeros_like(svec_ref)

    g = grad_ref[...].astype(f32)                     # (TILE_N, D)
    wv = wv_ref[...]                                  # (TILE_N, 1)
    scal = scal_ref[...]                              # (8, TILE_N)
    q = scal[0:1, :]
    z = scal[1:2, :]
    labels = scal[2:3, :]
    valid = scal[3:4, :] > 0.5                        # padded lanes are invalid

    # ---- hot path: variational numerator (1/m and 1/cell^2 applied outside) ----
    # axis-0 reduce: VPU adds down the sublane-block axis, fully f32.
    acc_ref[...] += jnp.sum(g * g * wv, axis=0, keepdims=True)[None]

    # ---- lane-dense masked sums / counts for boundary + z terms ----
    mask_A = jnp.logical_and(labels == 0.0, valid)
    mask_B = jnp.logical_and(labels == 1.0, valid)
    if separate_boundary_dataset:
        mask_var = jnp.logical_and(labels > 1.0, valid)
    else:
        mask_var = valid

    if z_threshold is not None:
        over = jnp.maximum(jnp.abs(z) - f32(z_threshold), 0.0)
        z_row = jnp.where(valid, over * over, 0.0)
    else:
        z_row = jnp.zeros_like(q)

    # Build the (8, TILE_N) update with a one-hot sublane selector (pure
    # iota/where/add elementwise ops -> robust lowering, negligible cost).
    tile_n = scal.shape[1]
    rid = jax.lax.broadcasted_iota(jnp.int32, (8, tile_n), 0)

    def put(row, vec):
        return jnp.where(rid == row, vec, 0.0)

    update = (put(0, mask_var.astype(f32))
              + put(1, mask_A.astype(f32))
              + put(2, mask_B.astype(f32))
              + put(3, jnp.where(mask_A, q * q, 0.0))
              + put(4, jnp.where(mask_B, (q - 1.0) * (q - 1.0), 0.0))
              + put(5, z_row))
    svec_ref[...] += update[None]


# ----------------------------------------------------------------------------
# Wrapper: layout prep, tiling, pallas_call, tiny final combine
# ----------------------------------------------------------------------------
def committor_loss_pallas(grad, q, z, labels, w, atomic_masses, *, alpha,
                          gamma=10000.0, delta_f=0.0, cell=None,
                          separate_boundary_dataset=True, log_var=False,
                          z_regularization=0.0, z_threshold=None, n_dim=3,
                          vmem_budget_bytes=32 * 1024 * 1024,
                          num_core_splits=None):
    # TODO(synk): descriptors_derivatives / SmartDerivatives / ref_idx path of
    # the reference module is not implemented (no Pallas equivalent here).
    f32 = jnp.float32
    N, D = grad.shape
    itemsize = jnp.dtype(grad.dtype).itemsize

    # --- core split (v7x has 2 TensorCores; serial & harmless on v5e/v6e) ---
    if num_core_splits is None:
        num_core_splits = 2 if N >= 256 else 1
    nc = int(num_core_splits)

    # --- tile sizing against an explicit VMEM budget -------------------------
    rows_per_core = pl.cdiv(N, nc)
    rows_pad = max(128, pl.cdiv(rows_per_core, 128) * 128)
    # per double-buffered step: grad tile + wv column (pads to 128 lanes) + scal
    per_row_bytes = D * itemsize + 512 + 32
    tile_cap = max(128, int((0.3 * vmem_budget_bytes) // per_row_bytes))
    tile_n = int(min(2048, tile_cap, rows_pad))
    tile_n = max(128, (tile_n // 128) * 128)
    tiles = pl.cdiv(rows_pad, tile_n)
    n_pad = nc * tiles * tile_n

    # --- build lane-dense scalar pack and variational weight column ----------
    qf = q.reshape(N).astype(f32)
    zf = z.reshape(N).astype(f32)
    lf = labels.reshape(N).astype(f32)
    wf = w.reshape(N).astype(f32)
    valid = jnp.ones((N,), f32)
    zeros = jnp.zeros((N,), f32)

    mask_A_h = lf == 0.0
    mask_B_h = lf == 1.0
    w_adj = wf
    if delta_f < 0:
        w_adj = jnp.where(mask_B_h, w_adj * math.exp(float(delta_f)), w_adj)
    elif delta_f > 0:
        w_adj = jnp.where(mask_A_h, w_adj * math.exp(-float(delta_f)), w_adj)
    if separate_boundary_dataset:
        mask_var_h = lf > 1.0
    else:
        mask_var_h = jnp.ones((N,), dtype=bool)
    wv = jnp.where(mask_var_h, w_adj, 0.0).reshape(N, 1)          # (N, 1)

    scal = jnp.stack([qf, zf, lf, valid, zeros, zeros, zeros, zeros], axis=0)

    if n_pad != N:
        grad = jnp.pad(grad, ((0, n_pad - N), (0, 0)))
        wv = jnp.pad(wv, ((0, n_pad - N), (0, 0)))
        scal = jnp.pad(scal, ((0, 0), (0, n_pad - N)))

    kernel = functools.partial(
        _committor_accum_kernel,
        separate_boundary_dataset=separate_boundary_dataset,
        z_threshold=z_threshold)

    bytes_accessed = int(n_pad * D * itemsize + n_pad * 4 + 8 * n_pad * 4
                         + nc * (D + 8 * tile_n) * 4)
    cost = pl.CostEstimate(flops=int(3 * n_pad * D + 16 * n_pad),
                           transcendentals=0, bytes_accessed=bytes_accessed)

    acc, svec = pl.pallas_call(
        kernel,
        out_shape=(jax.ShapeDtypeStruct((nc, 1, D), f32),
                   jax.ShapeDtypeStruct((nc, 8, tile_n), f32)),
        grid=(nc, tiles),
        in_specs=[
            pl.BlockSpec((tile_n, D), lambda c, t: (c * tiles + t, 0)),
            pl.BlockSpec((tile_n, 1), lambda c, t: (c * tiles + t, 0)),
            pl.BlockSpec((8, tile_n), lambda c, t: (0, c * tiles + t)),
        ],
        out_specs=(
            pl.BlockSpec((1, 1, D), lambda c, t: (c, 0, 0)),
            pl.BlockSpec((1, 8, tile_n), lambda c, t: (c, 0, 0)),
        ),
        compiler_params=pltpu.CompilerParams(
            dimension_semantics=("parallel", "arbitrary"),
            vmem_limit_bytes=int(vmem_budget_bytes)),
        cost_estimate=cost,
    )(grad, wv, scal)

    # --- tiny final combine in plain JAX (O(nc*D + 8) work) ------------------
    inv_masses = 1.0 / jnp.repeat(atomic_masses.astype(f32), n_dim)   # (D,)
    if cell is not None:
        inv_masses = inv_masses / (float(cell) * float(cell))  # grad/cell squared

    var_num = jnp.sum(acc.reshape(nc, D) * inv_masses[None, :])
    sums = jnp.sum(svec, axis=(0, 2))                                 # (8,)
    # max(count, 1) guards NaN when a mask is empty (reference would NaN).
    n_var = jnp.maximum(sums[0], 1.0)
    n_A = jnp.maximum(sums[1], 1.0)
    n_B = jnp.maximum(sums[2], 1.0)

    loss_var = var_num / n_var
    if log_var:
        loss_var = jnp.log1p(loss_var)
    else:
        loss_var = gamma * loss_var
    loss_A = gamma * sums[3] / n_A
    loss_B = gamma * sums[4] / n_B
    if z_threshold is not None:
        loss_z = z_regularization * sums[5] / N
    else:
        loss_z = 0.0

    loss = loss_var + alpha * (loss_A + loss_B) + loss_z
    return loss, loss_var, alpha * loss_A, alpha * loss_B


# ----------------------------------------------------------------------------
# Plain-JAX reference (direct transcription of the torch code) for validation
# ----------------------------------------------------------------------------
def committor_loss_ref(grad, q, labels, w, atomic_masses, *, alpha, gamma,
                       delta_f, n_dim, separate_boundary_dataset=True,
                       cell=None):
    masses_rep = jnp.repeat(atomic_masses, n_dim)
    labels = labels.reshape(-1)
    mask_A = labels == 0
    mask_B = labels == 1
    if separate_boundary_dataset:
        mask_var = labels > 1
    else:
        mask_var = jnp.ones_like(mask_A)
    w = w.reshape(-1, 1)
    if delta_f < 0:
        w = jnp.where(mask_B[:, None], w * jnp.exp(delta_f), w)
    elif delta_f > 0:
        w = jnp.where(mask_A[:, None], w * jnp.exp(-delta_f), w)
    if cell is not None:
        grad = grad / cell
    gsq = jnp.sum(grad ** 2 * (1.0 / masses_rep), axis=1, keepdims=True)
    loss_var = gamma * jnp.sum(
        jnp.where(mask_var[:, None], gsq * w, 0.0)) / jnp.sum(mask_var)
    loss_A = gamma * jnp.sum(
        jnp.where(mask_A, q.reshape(-1) ** 2, 0.0)) / jnp.sum(mask_A)
    loss_B = gamma * jnp.sum(
        jnp.where(mask_B, (q.reshape(-1) - 1.0) ** 2, 0.0)) / jnp.sum(mask_B)
    loss = loss_var + alpha * (loss_A + loss_B)
    return loss, loss_var, alpha * loss_A, alpha * loss_B


# ----------------------------------------------------------------------------
# Demo
# ----------------------------------------------------------------------------
if __name__ == "__main__":
    key = jax.random.PRNGKey(0)
    N, n_atoms, n_dim, H = 32, 16, 3, 32
    D = n_atoms * n_dim
    alpha, gamma = 1.0, 10000.0

    k_x, k_w1, k_w2, k_m, k_w = jax.random.split(key, 5)
    x = jax.random.normal(k_x, (N, D), jnp.float32)
    # deterministic synthetic committor model q(x) = sigmoid(z(x))
    W1 = jax.random.normal(k_w1, (D, H), jnp.float32) * 0.1
    b1 = jnp.zeros((H,), jnp.float32)
    W2 = jax.random.normal(k_w2, (H, 1), jnp.float32) * 0.1
    b2 = jnp.zeros((1,), jnp.float32)

    def z_fn(xx):
        return jnp.tanh(xx @ W1 + b1) @ W2 + b2

    def q_sum(xx):
        return jnp.sum(jax.nn.sigmoid(z_fn(xx)))

    z = z_fn(x)                       # (N, 1) unactivated output
    q = jax.nn.sigmoid(z)             # (N, 1) committor guess
    # TODO(synk): reverse-mode AD of the external committor model (dq/dx) has
    # no Pallas primitive; it is computed with jax.grad in plain-JAX glue,
    # mirroring torch.autograd.grad in the reference.
    grad = jax.grad(q_sum)(x)         # (N, D) per-sample dq_i/dx_i

    labels = jnp.concatenate([jnp.zeros(8), jnp.ones(8),
                              2.0 * jnp.ones(16)]).astype(jnp.float32)
    w = jax.random.uniform(k_w, (N,), jnp.float32, 0.5, 1.5)
    atomic_masses = jax.random.uniform(k_m, (n_atoms,), jnp.float32, 1.0, 20.0)

    configs = [
        dict(delta_f=0.0, separate_boundary_dataset=True, cell=None),
        dict(delta_f=-0.3, separate_boundary_dataset=False, cell=2.5),
    ]
    for cfg in configs:
        out = committor_loss_pallas(grad, q, z, labels, w, atomic_masses,
                                    alpha=alpha, gamma=gamma, n_dim=n_dim,
                                    **cfg)
        out = jax.block_until_ready(out)
        ref = committor_loss_ref(grad, q, labels, w, atomic_masses,
                                 alpha=alpha, gamma=gamma, n_dim=n_dim, **cfg)
        for a, b in zip(out, ref):
            assert jnp.allclose(a, b, rtol=1e-4, atol=1e-3), (cfg, a, b)

    print("KERNEL_OK")
</pallas_src>

<mosaic_0001>
module attributes {stable_mosaic.version = 11 : i64} {
  func.func @_committor_accum_kernel(%arg0: i32, %arg1: i32, %arg2: memref<128x48xf32, #tpu.memory_space<vmem>>, %arg3: memref<128x1xf32, #tpu.memory_space<vmem>>, %arg4: memref<8x128xf32, #tpu.memory_space<vmem>>, %arg5: memref<1x1x48xf32, #tpu.memory_space<vmem>>, %arg6: memref<1x8x128xf32, #tpu.memory_space<vmem>>) attributes {dimension_semantics = [#tpu.dimension_semantics<parallel>, #tpu.dimension_semantics<arbitrary>], iteration_bounds = array<i64: 1, 1>, scalar_prefetch = 0 : i64, scratch_operands = 0 : i64, tpu.core_type = #tpu.core_type<tc>, window_params = [{transform_indices = @transform_0, window_bounds = array<i64: 128, 48>}, {transform_indices = @transform_1, window_bounds = array<i64: 128, 1>}, {transform_indices = @transform_2, window_bounds = array<i64: 8, 128>}, {transform_indices = @transform_3, window_bounds = array<i64: 1, 1, 48>}, {transform_indices = @transform_4, window_bounds = array<i64: 1, 8, 128>}]} {
    %c0_i32 = arith.constant 0 : i32
    %0 = arith.cmpi eq, %arg1, %c0_i32 : i32
    %1 = arith.extui %0 : i1 to i32
    %c0_i32_0 = arith.constant 0 : i32
    %2 = arith.cmpi ne, %1, %c0_i32_0 : i32
    scf.if %2 {
      %cst_34 = arith.constant 0.000000e+00 : f32
      %92 = vector.broadcast %cst_34 : f32 to vector<1x1x48xf32>
      %c0_35 = arith.constant 0 : index
      %c0_36 = arith.constant 0 : index
      %c0_37 = arith.constant 0 : index
      %93 = vector.load %arg5[%c0_35, %c0_36, %c0_37] : memref<1x1x48xf32, #tpu.memory_space<vmem>>, vector<1x1x48xf32>
      tpu.vector_store %arg5[%c0_35, %c0_36, %c0_37], %92 {strides = array<i32>} : memref<1x1x48xf32, #tpu.memory_space<vmem>>, vector<1x1x48xf32>,
      %cst_38 = arith.constant 0.000000e+00 : f32
      %94 = vector.broadcast %cst_38 : f32 to vector<1x8x128xf32>
      %c0_39 = arith.constant 0 : index
      %c0_40 = arith.constant 0 : index
      %c0_41 = arith.constant 0 : index
      %95 = vector.load %arg6[%c0_39, %c0_40, %c0_41] : memref<1x8x128xf32, #tpu.memory_space<vmem>>, vector<1x8x128xf32>
      tpu.vector_store %arg6[%c0_39, %c0_40, %c0_41], %94 {strides = array<i32>} : memref<1x8x128xf32, #tpu.memory_space<vmem>>, vector<1x8x128xf32>,
    } else {
    }
    %c0 = arith.constant 0 : index
    %c0_1 = arith.constant 0 : index
    %3 = vector.load %arg2[%c0, %c0_1] : memref<128x48xf32, #tpu.memory_space<vmem>>, vector<128x48xf32>
    %c0_2 = arith.constant 0 : index
    %c0_3 = arith.constant 0 : index
    %4 = vector.load %arg3[%c0_2, %c0_3] : memref<128x1xf32, #tpu.memory_space<vmem>>, vector<128x1xf32>
    %c0_4 = arith.constant 0 : index
    %c0_5 = arith.constant 0 : index
    %5 = vector.load %arg4[%c0_4, %c0_5] : memref<8x128xf32, #tpu.memory_space<vmem>>, vector<8x128xf32>
    %6 = vector.extract_strided_slice %5 {offsets = [0, 0], sizes = [1, 128], strides = [1, 1]} : vector<8x128xf32> to vector<1x128xf32>
    %7 = vector.extract_strided_slice %5 {offsets = [2, 0], sizes = [1, 128], strides = [1, 1]} : vector<8x128xf32> to vector<1x128xf32>
    %8 = vector.extract_strided_slice %5 {offsets = [3, 0], sizes = [1, 128], strides = [1, 1]} : vector<8x128xf32> to vector<1x128xf32>
    %cst = arith.constant 5.000000e-01 : f32
    %9 = vector.broadcast %cst : f32 to vector<1x128xf32>
    %10 = arith.cmpf ogt, %8, %9 : vector<1x128xf32>
    %c0_6 = arith.constant 0 : index
    %c0_7 = arith.constant 0 : index
    %c0_8 = arith.constant 0 : index
    %11 = vector.load %arg5[%c0_6, %c0_7, %c0_8] : memref<1x1x48xf32, #tpu.memory_space<vmem>>, vector<1x1x48xf32>
    %12 = arith.mulf %3, %3 : vector<128x48xf32>
    %13 = vector.broadcast %4 : vector<128x1xf32> to vector<128x48xf32>
    %14 = arith.mulf %12, %13 : vector<128x48xf32>
    %cst_9 = arith.constant dense<0.000000e+00> : vector<48xf32>
    %15 = vector.multi_reduction <add>, %14, %cst_9 [0] : vector<128x48xf32> to vector<48xf32>
    %16 = vector.shape_cast %15 : vector<48xf32> to vector<1x48xf32>
    %17 = vector.shape_cast %16 : vector<1x48xf32> to vector<1x1x48xf32>
    %18 = arith.addf %11, %17 : vector<1x1x48xf32>
    %c0_10 = arith.constant 0 : index
    %c0_11 = arith.constant 0 : index
    %c0_12 = arith.constant 0 : index
    %19 = vector.load %arg5[%c0_10, %c0_11, %c0_12] : memref<1x1x48xf32, #tpu.memory_space<vmem>>, vector<1x1x48xf32>
    tpu.vector_store %arg5[%c0_10, %c0_11, %c0_12], %18 {strides = array<i32>} : memref<1x1x48xf32, #tpu.memory_space<vmem>>, vector<1x1x48xf32>,
    %cst_13 = arith.constant 0.000000e+00 : f32
    %20 = vector.broadcast %cst_13 : f32 to vector<1x128xf32>
    %21 = arith.cmpf oeq, %7, %20 : vector<1x128xf32>
    %22 = arith.andi %21, %10 : vector<1x128xi1>
    %cst_14 = arith.constant 1.000000e+00 : f32
    %23 = vector.broadcast %cst_14 : f32 to vector<1x128xf32>
    %24 = arith.cmpf oeq, %7, %23 : vector<1x128xf32>
    %25 = arith.andi %24, %10 : vector<1x128xi1>
    %cst_15 = arith.constant 1.000000e+00 : f32
    %26 = vector.broadcast %cst_15 : f32 to vector<1x128xf32>
    %27 = arith.cmpf ogt, %7, %26 : vector<1x128xf32>
    %28 = arith.andi %27, %10 : vector<1x128xi1>
    %cst_16 = arith.constant 0.000000e+00 : f32
    %29 = vector.broadcast %cst_16 : f32 to vector<1x128xf32>
    %30 = tpu.iota {dimensions = array<i32: 0>} : vector<8x128xi32>
    %31 = arith.extui %28 : vector<1x128xi1> to vector<1x128xi32>
    %32 = arith.sitofp %31 : vector<1x128xi32> to vector<1x128xf32>
    %c0_i32_17 = arith.constant 0 : i32
    %33 = vector.broadcast %c0_i32_17 : i32 to vector<8x128xi32>
    %34 = arith.cmpi eq, %30, %33 : vector<8x128xi32>
    %cst_18 = arith.constant 0.000000e+00 : f32
    %35 = vector.shape_cast %32 : vector<1x128xf32> to vector<1x128xf32>
    %36 = vector.broadcast %35 : vector<1x128xf32> to vector<8x128xf32>
    %37 = vector.broadcast %cst_18 : f32 to vector<8x128xf32>
    %38 = arith.select %34, %36, %37 : vector<8x128xi1>, vector<8x128xf32>
    %39 = arith.extui %22 : vector<1x128xi1> to vector<1x128xi32>
    %40 = arith.sitofp %39 : vector<1x128xi32> to vector<1x128xf32>
    %c1_i32 = arith.constant 1 : i32
    %41 = vector.broadcast %c1_i32 : i32 to vector<8x128xi32>
    %42 = arith.cmpi eq, %30, %41 : vector<8x128xi32>
    %cst_19 = arith.constant 0.000000e+00 : f32
    %43 = vector.shape_cast %40 : vector<1x128xf32> to vector<1x128xf32>
    %44 = vector.broadcast %43 : vector<1x128xf32> to vector<8x128xf32>
    %45 = vector.broadcast %cst_19 : f32 to vector<8x128xf32>
    %46 = arith.select %42, %44, %45 : vector<8x128xi1>, vector<8x128xf32>
    %47 = arith.addf %38, %46 : vector<8x128xf32>
    %48 = arith.extui %25 : vector<1x128xi1> to vector<1x128xi32>
    %49 = arith.sitofp %48 : vector<1x128xi32> to vector<1x128xf32>
    %c2_i32 = arith.constant 2 : i32
    %50 = vector.broadcast %c2_i32 : i32 to vector<8x128xi32>
    %51 = arith.cmpi eq, %30, %50 : vector<8x128xi32>
    %cst_20 = arith.constant 0.000000e+00 : f32
    %52 = vector.shape_cast %49 : vector<1x128xf32> to vector<1x128xf32>
    %53 = vector.broadcast %52 : vector<1x128xf32> to vector<8x128xf32>
    %54 = vector.broadcast %cst_20 : f32 to vector<8x128xf32>
    %55 = arith.select %51, %53, %54 : vector<8x128xi1>, vector<8x128xf32>
    %56 = arith.addf %47, %55 : vector<8x128xf32>
    %57 = arith.mulf %6, %6 : vector<1x128xf32>
    %cst_21 = arith.constant 0.000000e+00 : f32
    %58 = vector.broadcast %cst_21 : f32 to vector<1x128xf32>
    %59 = arith.select %22, %57, %58 : vector<1x128xi1>, vector<1x128xf32>
    %c3_i32 = arith.constant 3 : i32
    %60 = vector.broadcast %c3_i32 : i32 to vector<8x128xi32>
    %61 = arith.cmpi eq, %30, %60 : vector<8x128xi32>
    %cst_22 = arith.constant 0.000000e+00 : f32
    %62 = vector.shape_cast %59 : vector<1x128xf32> to vector<1x128xf32>
    %63 = vector.broadcast %62 : vector<1x128xf32> to vector<8x128xf32>
    %64 = vector.broadcast %cst_22 : f32 to vector<8x128xf32>
    %65 = arith.select %61, %63, %64 : vector<8x128xi1>, vector<8x128xf32>
    %66 = arith.addf %56, %65 : vector<8x128xf32>
    %cst_23 = arith.constant 1.000000e+00 : f32
    %67 = vector.broadcast %cst_23 : f32 to vector<1x128xf32>
    %68 = arith.subf %6, %67 : vector<1x128xf32>
    %cst_24 = arith.constant 1.000000e+00 : f32
    %69 = vector.broadcast %cst_24 : f32 to vector<1x128xf32>
    %70 = arith.subf %6, %69 : vector<1x128xf32>
    %71 = arith.mulf %68, %70 : vector<1x128xf32>
    %cst_25 = arith.constant 0.000000e+00 : f32
    %72 = vector.broadcast %cst_25 : f32 to vector<1x128xf32>
    %73 = arith.select %25, %71, %72 : vector<1x128xi1>, vector<1x128xf32>
    %c4_i32 = arith.constant 4 : i32
    %74 = vector.broadcast %c4_i32 : i32 to vector<8x128xi32>
    %75 = arith.cmpi eq, %30, %74 : vector<8x128xi32>
    %cst_26 = arith.constant 0.000000e+00 : f32
    %76 = vector.shape_cast %73 : vector<1x128xf32> to vector<1x128xf32>
    %77 = vector.broadcast %76 : vector<1x128xf32> to vector<8x128xf32>
    %78 = vector.broadcast %cst_26 : f32 to vector<8x128xf32>
    %79 = arith.select %75, %77, %78 : vector<8x128xi1>, vector<8x128xf32>
    %80 = arith.addf %66, %79 : vector<8x128xf32>
    %c5_i32 = arith.constant 5 : i32
    %81 = vector.broadcast %c5_i32 : i32 to vector<8x128xi32>
    %82 = arith.cmpi eq, %30, %81 : vector<8x128xi32>
    %cst_27 = arith.constant 0.000000e+00 : f32
    %83 = vector.shape_cast %29 : vector<1x128xf32> to vector<1x128xf32>
    %84 = vector.broadcast %83 : vector<1x128xf32> to vector<8x128xf32>
    %85 = vector.broadcast %cst_27 : f32 to vector<8x128xf32>
    %86 = arith.select %82, %84, %85 : vector<8x128xi1>, vector<8x128xf32>
    %87 = arith.addf %80, %86 : vector<8x128xf32>
    %c0_28 = arith.constant 0 : index
    %c0_29 = arith.constant 0 : index
    %c0_30 = arith.constant 0 : index
    %88 = vector.load %arg6[%c0_28, %c0_29, %c0_30] : memref<1x8x128xf32, #tpu.memory_space<vmem>>, vector<1x8x128xf32>
    %89 = vector.shape_cast %87 : vector<8x128xf32> to vector<1x8x128xf32>
    %90 = arith.addf %88, %89 : vector<1x8x128xf32>
    %c0_31 = arith.constant 0 : index
    %c0_32 = arith.constant 0 : index
    %c0_33 = arith.constant 0 : index
    %91 = vector.load %arg6[%c0_31, %c0_32, %c0_33] : memref<1x8x128xf32, #tpu.memory_space<vmem>>, vector<1x8x128xf32>
    tpu.vector_store %arg6[%c0_31, %c0_32, %c0_33], %90 {strides = array<i32>} : memref<1x8x128xf32, #tpu.memory_space<vmem>>, vector<1x8x128xf32>,
    return
  }
  func.func @transform_0(%arg0: i32, %arg1: i32) -> (i32, i32) {
    %c1_i32 = arith.constant 1 : i32
    %0 = arith.muli %arg0, %c1_i32 : i32
    %1 = arith.addi %0, %arg1 : i32
    %c0_i32 = arith.constant 0 : i32
    %c0_i32_0 = arith.constant 0 : i32
    return %1, %c0_i32 : i32, i32
  }
  func.func @transform_1(%arg0: i32, %arg1: i32) -> (i32, i32) {
    %c1_i32 = arith.constant 1 : i32
    %0 = arith.muli %arg0, %c1_i32 : i32
    %1 = arith.addi %0, %arg1 : i32
    %c0_i32 = arith.constant 0 : i32
    %c0_i32_0 = arith.constant 0 : i32
    return %1, %c0_i32 : i32, i32
  }
  func.func @transform_2(%arg0: i32, %arg1: i32) -> (i32, i32) {
    %c1_i32 = arith.constant 1 : i32
    %0 = arith.muli %arg0, %c1_i32 : i32
    %1 = arith.addi %0, %arg1 : i32
    %c0_i32 = arith.constant 0 : i32
    %c0_i32_0 = arith.constant 0 : i32
    return %c0_i32, %1 : i32, i32
  }
  func.func @transform_3(%arg0: i32, %arg1: i32) -> (i32, i32, i32) {
    %c0_i32 = arith.constant 0 : i32
    %c0_i32_0 = arith.constant 0 : i32
    %c0_i32_1 = arith.constant 0 : i32
    return %arg0, %c0_i32, %c0_i32_0 : i32, i32, i32
  }
  func.func @transform_4(%arg0: i32, %arg1: i32) -> (i32, i32, i32) {
    %c0_i32 = arith.constant 0 : i32
    %c0_i32_0 = arith.constant 0 : i32
    %c0_i32_1 = arith.constant 0 : i32
    return %arg0, %c0_i32, %c0_i32_0 : i32, i32, i32
  }
}

</mosaic_0001>

<bundles_post_ra>
// kernel: tpu_custom_call.1
= control target key start
LH: loop header
LB: loop body
LE: loop exit
PB: predicated region body
PF: predicated region fallthrough
CT: control target
= control target key end

     0   :  { %10 = vsyncpa [#allocation3], 0  ;;  %v444_v2 = vmov 0   ;;  %s632_s0 = inlined_call_operand.vmem [shape: f32[128,48], index: 0, kind: input, shape index: {}]   ;;  %s633_s1 = inlined_call_operand.vmem [shape: f32[128,1], index: 1, kind: input, shape index: {}]   ;;  %s634_s2 = inlined_call_operand.vmem [shape: f32[8,128], index: 2, kind: input, shape index: {}]   ;;  %s635_s3 = inlined_call_operand.hbm [shape: f32[1,1,48], index: 3, kind: output, shape index: {0}]   ;;  %s636_s4 = inlined_call_operand.hbm [shape: f32[1,8,128], index: 4, kind: output, shape index: {1}]  }
   0x1   :  { %v104_v0 = vld [vmem:[%s633_s1 + $0x10] sm:$0xff]  ;;  %v102_v1 = vld [vmem:[%s633_s1] sm:$0xff]  ;;  %395 = vset.pattern.permute.xlu1 %v444_v2  ;;  %394 = vset.pattern.permute.xlu0 %v444_v2  ;;  %v105_v3 = vld [vmem:[%s633_s1 + $0x18] sm:$0xff] }
   0x2   :  { %149 = vperm.xlu1 %395, %v104_v0   ;;  %139 = vperm.xlu0 %394, %v102_v1   ;;  %v103_v4 = vld [vmem:[%s633_s1 + $0x8] sm:$0xff]  ;;  %v106_v6 = vld [vmem:[%s633_s1 + $0x20] sm:$0xff] }
   0x3   :  { %v107_v5 = vld [vmem:[%s633_s1 + $0x28] sm:$0xff] }
   0x6   :  { %154 = vperm.xlu1 %395, %v105_v3   ;;  %144 = vperm.xlu0 %394, %v103_v4  }
   0x7   :  { %11 = vsyncpa [#allocation5], 0  ;;  %v118_v7 = vld [vmem:[%s634_s2] sm:$0xff]  ;;  %v109_v8 = vld [vmem:[%s633_s1 + $0x38] sm:$0xff]  ;;  %v283_v16 = vlaneseq  ;;  %v445_v26 = vmov 0.0   ;;  %vm83_vm11 = vcmask 385024  }
   0x8   :  { %v108_v9 = vld [vmem:[%s633_s1 + $0x30] sm:$0xff]  ;;  %vm119_vm0 = vcmp.gt.f32.partialorder %v118_v7, 0.5  ;;  %v111_v10 = vld [vmem:[%s633_s1 + $0x48] sm:$0xff]  ;;  %v110_v11 = vld [vmem:[%s633_s1 + $0x40] sm:$0xff]  ;;  %vm274_vm1 = vcmp.eq.f32.partialorder %v118_v7, 0.0  ;;  %vm281_vm3 = vcmp.gt.f32.partialorder %v118_v7, 1.0  ;;  %v311_v29 = vmul.f32 %v118_v7, %v118_v7 }
   0x9   :  { %v275_v12 = vsel %vm119_vm0, 1, %v444_v2  ;;  %v113_v13 = vld [vmem:[%s633_s1 + $0x58] sm:$0xff]  ;;  %v112_v14 = vld [vmem:[%s633_s1 + $0x50] sm:$0xff]  ;;  %v115_v17 = vld [vmem:[%s633_s1 + $0x68] sm:$0xff]  ;;  %v284_v20 = vshrl.u32 %v283_v16, 7  ;;  %vm279_vm6 = vcmp.eq.f32.partialorder %v118_v7, 1.0 }
   0xa   :  { %164 = vperm.xlu1 %395, %v107_v5   ;;  %159 = vperm.xlu0 %394, %v106_v6   ;;  %v276_v15 = vrot.slane %v275_v12, 1  ;;  %v114_v18 = vld [vmem:[%s633_s1 + $0x60] sm:$0xff]  ;;  %v117_v22 = vld [vmem:[%s633_s1 + $0x78] sm:$0xff]  ;;  %v116_v23 = vld [vmem:[%s633_s1 + $0x70] sm:$0xff]  ;;  %v389_v24 = vadd.f32 -1.0, %v118_v7  ;;  %v313_v34 = vrot.slane %v311_v29, 6 }
   0xb   :  { %v290_v25 = vsub.s32 2, %v284_v20  ;;  %vm287_vm8 = vcmp.eq.s32.totalorder %v284_v20, 0  ;;  %vm295_vm9 = vcmp.eq.s32.totalorder %v284_v20, 1  ;;  %vm304_vm10 = vcmp.eq.s32.totalorder %v284_v20, 2  ;;  %84 = vst.msk [vmem:[#allocation2] sm:$0x1] %vm83_vm11, %v445_v26 }
   0xc   :  { %vm518_vm2 = vcmp.ne.s32.totalorder %v276_v15, 0  ;;  %v324_v30 = vmul.f32 %v389_v24, %v389_v24  ;;  %vm316_vm12 = vcmp.eq.s32.totalorder %v284_v20, 3  ;;  %vm329_vm13 = vcmp.eq.s32.totalorder %v284_v20, 4  ;;  %s446_s1 = smov [#allocation4]  }
   0xd   :  { %vm524_vm4 = vmand %vm274_vm1, %vm518_vm2  ;;  %s356_s22 = sshll.u32 %s446_s1, 4  ;;  %s357_s22 = int_to_ptr.vmem [resolvable:$true] %s356_s22 }
   0xe   :  { %174 = vperm.xlu1 %395, %v109_v8   ;;  %169 = vperm.xlu0 %394, %v108_v9   ;;  %vm282_vm5 = vmand %vm281_vm3, %vm518_vm2  ;;  %v387_v28 = vsel %vm524_vm4, 1.0, %v445_v26  ;;  %v326_v35 = vrot.slane %v324_v30, 6  ;;  %v315_v39 = vsel %vm524_vm4, %v313_v34, 0.0  ;;  %s396_s23 = scalar_lea.vmem %s357_s22, 128  ;;  %p401_p1 = scmp.lt.s32.totalorder %s357_s22, %s357_s22 }
   0xf   :  { %v386_v27 = vsel %vm282_vm5, 1.0, %v445_v26  ;;  %vm280_vm7 = vmand %vm279_vm6, %vm518_vm2  ;;  %v299_v32 = vrot.slane %v387_v28, %v290_v25  ;;  %v320_v43 = vrot.slane %v315_v39, %v290_v25  ;;  %p397_p0 = scmp.ne.s32.totalorder %s357_s22, %s396_s23  ;;  %p402_p2 = scmp.lt.s32.totalorder %s396_s23, %s396_s23 }
  0x10   :  { %v291_v31 = vrot.slane %v386_v27, %v290_v25  ;;  %v388_v33 = vsel %vm280_vm7, 1.0, %v445_v26  ;;  %v328_v41 = vsel %vm280_vm7, %v326_v35, 0.0 }
  0x11   :  { %v300_v37 = vsel %vm295_vm9, %v299_v32, 0.0  ;;  %v308_v38 = vrot.slane %v388_v33, %v290_v25  ;;  %v333_v44 = vrot.slane %v328_v41, %v290_v25  ;;  %v321_v46 = vsel %vm316_vm12, %v320_v43, 0.0  ;;  %p403_p3 = por %p402_p2, %p401_p1 }
  0x12   :  { %184 = vperm.xlu1 %395, %v111_v10   ;;  %179 = vperm.xlu0 %394, %v110_v11   ;;  %v292_v36 = vsel %vm287_vm8, %v291_v31, 0.0 }
  0x13   :  { %v301_v40 = vadd.f32 %v300_v37, %v292_v36  ;;  %v309_v42 = vsel %vm304_vm10, %v308_v38, 0.0  ;;  %v334_v48 = vsel %vm329_vm13, %v333_v44, 0.0  ;;  %p404_p4 = pnand %p403_p3, %p397_p0 }
  0x15   :  { %v310_v45 = vadd.f32 %v309_v42, %v301_v40 }
  0x16   :  { %194 = vperm.xlu1 %395, %v113_v13   ;;  %189 = vperm.xlu0 %394, %v112_v14  }
  0x17   :  { %v322_v47 = vadd.f32 %v321_v46, %v310_v45 }
  0x19   :  { %v335_v49 = vadd.f32 %v334_v48, %v322_v47 }
  0x1a   :  { %204 = vperm.xlu1 %395, %v115_v17   ;;  %199 = vperm.xlu0 %394, %v114_v18  }
  0x1b   :  { %339 = vst [vmem:[#allocation4] sm:$0xff] %v335_v49 }
  0x1e   :  { %214 = vperm.xlu1 %395, %v117_v22   ;;  %209 = vperm.xlu0 %394, %v116_v23  }
  0x1f   :  { %407 = shalt.err (!%p404_p4)
}
  0x20   :  { %s408_s26 = scalar_lea.hbm %s636_s4, 128 }
  0x21   :  { %p409_p5 = scmp.ne.s32.totalorder %s636_s4, %s408_s26  ;;  %p412_p6 = scmp.lt.u32.totalorder %s408_s26, %s636_s4 }
  0x23   :  { %p414_p7 = pnand %p412_p6, %p409_p5 }
  0x25   :  { %417 = shalt.err (!%p414_p7)
}
  0x26   :  { %359 = dma.vmem_to_hbm [thread:$0]  %s357_s22, 128, %s636_s4, [#allocation5]   ;;  %v86_v50 = vld [vmem:[%s632_s0] sm:$0xff]  ;;  %v88_v51 = vld [vmem:[%s632_s0 + $0x10] sm:$0xff]  ;;  %v87_v52 = vld [vmem:[%s632_s0 + $0x8] sm:$0xff]  ;;  %vm233_vm14 = vcmask 392192  }
  0x27   :  { %v121_v53 = vmul.f32 %v86_v50, %v86_v50  ;;  %v89_v56 = vld [vmem:[%s632_s0 + $0x18] sm:$0xff]  ;;  %v123_v57 = vmul.f32 %v88_v51, %v88_v51  ;;  %v122_v58 = vmul.f32 %v87_v52, %v87_v52  ;;  %v90_v59 = vld [vmem:[%s632_s0 + $0x20] sm:$0xff]  ;;  %v91_v0 = vld [vmem:[%s632_s0 + $0x28] sm:$0xff] }
  0x28   :  { %v124_v61 = vmul.f32 %v89_v56, %v89_v56  ;;  %v125_v3 = vmul.f32 %v90_v59, %v90_v59  ;;  %v92_v4 = vld [vmem:[%s632_s0 + $0x30] sm:$0xff]  ;;  %v126_v8 = vmul.f32 %v91_v0, %v91_v0  ;;  %v93_v12 = vld [vmem:[%s632_s0 + $0x38] sm:$0xff]  ;;  %v94_v17 = vld [vmem:[%s632_s0 + $0x40] sm:$0xff] }
  0x29   :  { %v127_v15 = vmul.f32 %v92_v4, %v92_v4  ;;  %v128_v20 = vmul.f32 %v93_v12, %v93_v12  ;;  %v95_v24 = vld [vmem:[%s632_s0 + $0x48] sm:$0xff]  ;;  %v129_v27 = vmul.f32 %v94_v17, %v94_v17  ;;  %v96_v29 = vld [vmem:[%s632_s0 + $0x50] sm:$0xff]  ;;  %v97_v36 = vld [vmem:[%s632_s0 + $0x58] sm:$0xff] }
  0x2a   :  { %v130_v32 = vmul.f32 %v95_v24, %v95_v24  ;;  %v131_v39 = vmul.f32 %v96_v29, %v96_v29  ;;  %v98_v41 = vld [vmem:[%s632_s0 + $0x60] sm:$0xff]  ;;  %v132_v44 = vmul.f32 %v97_v36, %v97_v36  ;;  %v99_v48 = vld [vmem:[%s632_s0 + $0x68] sm:$0xff] }
  0x2b   :  { %v133_v51 = vmul.f32 %v98_v41, %v98_v41  ;;  %v134_v56 = vmul.f32 %v99_v48, %v99_v48 }
  0x81   :  { %v150_v54 = vpop.permute.xlu1 %149  ;;  %v140_v55 = vpop.permute.xlu0 %139 }
  0x82   :  { %v217_v60 = vmul.f32 %v140_v55, %v121_v53  ;;  %v219_v1 = vmul.f32 %v150_v54, %v123_v57  ;;  %v100_v53 = vld [vmem:[%s632_s0 + $0x70] sm:$0xff] }
  0x84   :  { %v234_v5 = vsel %vm233_vm14, %v217_v60, 0.0  ;;  %v237_v13 = vsel %vm233_vm14, %v219_v1, 0.0  ;;  %v101_v60 = vld [vmem:[%s632_s0 + $0x78] sm:$0xff]  ;;  %s447_s0 = smov [#allocation2]  }
  0x85   :  { %v155_v62 = vpop.permute.xlu1 %154  ;;  %v145_v63 = vpop.permute.xlu0 %144  ;;  %s346_s10 = sshll.u32 %s447_s0, 4  ;;  %s347_s10 = int_to_ptr.vmem [resolvable:$true] %s346_s10 }
  0x86   :  { %v218_v2 = vmul.f32 %v145_v63, %v122_v58  ;;  %v220_v6 = vmul.f32 %v155_v62, %v124_v61  ;;  %v135_v63 = vmul.f32 %v100_v53, %v100_v53  ;;  %s418_s2 = scalar_lea.vmem %s347_s10, 16  ;;  %s422_s11 = scalar_lea.vmem %s347_s10, 32 }
  0x87   :  { %p419_p8 = scmp.ne.s32.totalorder %s347_s10, %s418_s2  ;;  %p423_p9 = scmp.lt.s32.totalorder %s347_s10, %s347_s10 }
  0x88   :  { %v235_v7 = vsel %vm233_vm14, %v218_v2, 0.0  ;;  %v239_v18 = vsel %vm233_vm14, %v220_v6, 0.0  ;;  %p424_p10 = scmp.lt.s32.totalorder %s422_s11, %s418_s2 }
  0x89   :  { %v236_v9 = vadd.f32 %v235_v7, %v234_v5  ;;  %v165_v10 = vpop.permute.xlu1 %164  ;;  %v160_v11 = vpop.permute.xlu0 %159 }
  0x8a   :  { %v221_v14 = vmul.f32 %v160_v11, %v125_v3  ;;  %v222_v19 = vmul.f32 %v165_v10, %v126_v8  ;;  %v136_v3 = vmul.f32 %v101_v60, %v101_v60  ;;  %p425_p11 = por %p424_p10, %p423_p9 }
  0x8b   :  { %v238_v16 = vadd.f32 %v237_v13, %v236_v9 }
  0x8c   :  { %v241_v25 = vsel %vm233_vm14, %v221_v14, 0.0  ;;  %v243_v30 = vsel %vm233_vm14, %v222_v19, 0.0  ;;  %p426_p12 = pnand %p425_p11, %p419_p8 }
  0x8d   :  { %v240_v21 = vadd.f32 %v239_v18, %v238_v16  ;;  %v175_v22 = vpop.permute.xlu1 %174  ;;  %v170_v23 = vpop.permute.xlu0 %169 }
  0x8e   :  { %v223_v26 = vmul.f32 %v170_v23, %v127_v15  ;;  %v224_v31 = vmul.f32 %v175_v22, %v128_v20  ;;  %v120_v22 = vld [vmem:[#allocation2] sm:$0x1] }
  0x8f   :  { %v242_v28 = vadd.f32 %v241_v25, %v240_v21 }
  0x90   :  { %v245_v37 = vsel %vm233_vm14, %v223_v26, 0.0  ;;  %v247_v42 = vsel %vm233_vm14, %v224_v31, 0.0 }
  0x91   :  { %v244_v33 = vadd.f32 %v243_v30, %v242_v28  ;;  %v185_v34 = vpop.permute.xlu1 %184  ;;  %v180_v35 = vpop.permute.xlu0 %179 }
  0x92   :  { %v225_v38 = vmul.f32 %v180_v35, %v129_v27  ;;  %v226_v43 = vmul.f32 %v185_v34, %v130_v32 }
  0x93   :  { %v246_v40 = vadd.f32 %v245_v37, %v244_v33 }
  0x94   :  { %v249_v49 = vsel %vm233_vm14, %v225_v38, 0.0  ;;  %v251_v54 = vsel %vm233_vm14, %v226_v43, 0.0 }
  0x95   :  { %v248_v45 = vadd.f32 %v247_v42, %v246_v40  ;;  %v195_v46 = vpop.permute.xlu1 %194  ;;  %v190_v47 = vpop.permute.xlu0 %189 }
  0x96   :  { %v227_v50 = vmul.f32 %v190_v47, %v131_v39  ;;  %v228_v55 = vmul.f32 %v195_v46, %v132_v44 }
  0x97   :  { %v250_v52 = vadd.f32 %v249_v49, %v248_v45 }
  0x98   :  { %v253_v61 = vsel %vm233_vm14, %v227_v50, 0.0  ;;  %v255_v1 = vsel %vm233_vm14, %v228_v55, 0.0 }
  0x99   :  { %v252_v57 = vadd.f32 %v251_v54, %v250_v52  ;;  %v205_v58 = vpop.permute.xlu1 %204  ;;  %v200_v59 = vpop.permute.xlu0 %199 }
  0x9a   :  { %v229_v62 = vmul.f32 %v200_v59, %v133_v51  ;;  %v230_v2 = vmul.f32 %v205_v58, %v134_v56 }
  0x9b   :  { %v254_v0 = vadd.f32 %v253_v61, %v252_v57 }
  0x9c   :  { %v257_v7 = vsel %vm233_vm14, %v229_v62, 0.0  ;;  %v259_v10 = vsel %vm233_vm14, %v230_v2, 0.0 }
  0x9d   :  { %v256_v4 = vadd.f32 %v255_v1, %v254_v0  ;;  %v215_v5 = vpop.permute.xlu1 %214  ;;  %v210_v6 = vpop.permute.xlu0 %209 }
  0x9e   :  { %v231_v8 = vmul.f32 %v210_v6, %v135_v63  ;;  %v232_v11 = vmul.f32 %v215_v5, %v136_v3 }
  0x9f   :  { %v258_v9 = vadd.f32 %v257_v7, %v256_v4 }
  0xa0   :  { %v261_v13 = vsel %vm233_vm14, %v231_v8, 0.0  ;;  %v263_v15 = vsel %vm233_vm14, %v232_v11, 0.0 }
  0xa1   :  { %v260_v12 = vadd.f32 %v259_v10, %v258_v9 }
  0xa3   :  { %v262_v14 = vadd.f32 %v261_v13, %v260_v12 }
  0xa5   :  { %v264_v16 = vadd.f32 %v263_v15, %v262_v14 }
  0xa7   :  { %v265_v17 = vrot.slane %v264_v16, 4 }
  0xa9   :  { %v266_v18 = vadd.f32 %v265_v17, %v264_v16 }
  0xab   :  { %v267_v19 = vrot.slane %v266_v18, 2 }
  0xad   :  { %v268_v20 = vadd.f32 %v267_v19, %v266_v18 }
  0xaf   :  { %v269_v21 = vrot.slane %v268_v20, 1 }
  0xb1   :  { %v270_v23 = vadd.f32 %v269_v21, %v268_v20 }
  0xb3   :  { %v271_v24 = vadd.f32 %v270_v23, %v120_v22 }
  0xb5   :  { %273 = vst.msk [vmem:[#allocation2] sm:$0x1] %vm83_vm11, %v271_v24 }
  0xb6   :  { %429 = shalt.err (!%p426_p12)
}
  0xb7   :  { %s430_s4 = scalar_lea.hbm %s635_s3, 16 }
  0xb8   :  { %p431_p13 = scmp.ne.s32.totalorder %s635_s3, %s430_s4  ;;  %p434_p0 = scmp.lt.u32.totalorder %s430_s4, %s635_s3 }
  0xba   :  { %p436_p1 = pnand %p434_p0, %p431_p13 }
  0xbc   :  { %439 = shalt.err (!%p436_p1)
}
  0xbd   :  { %349 = dma.vmem_to_hbm [thread:$0]  %s347_s10, 16, %s635_s3, [#allocation3]  }
  0xbe   :  { %440 = dma.done.wait [#allocation3], 16  }
  0xbf   :  { %441 = vsyncadd [#allocation3], 4294967280 }
  0xc0   :  { %442 = dma.done.wait [#allocation5], 128  }
  0xc1   :  { %443 = vsyncadd [#allocation5], 4294967168 }
  0xc2   :  { %366 = vsyncpa [#allocation3], 1 }
  0xc3   :  { %367 = vsyncpa [#allocation5], 1 }

</bundles_post_ra>
